<compile_context>
chip_gen: v7x
topology: tpu7x:2x2x1
jax: 0.10.0
libtpu: 0.0.40
codegen_flags: <defaults>
</compile_context>

<pallas_src>
import jax
import jax.numpy as jnp
from jax.experimental import pallas as pl
from jax.experimental.pallas import tpu as pltpu


def _wlp_kernel_direct(w_ref, x_ref, o_ref):
    """f32 output: accumulate directly into the resident output block.

    w_ref : SMEM (L_used,) f32 pre-normalized weights (scalar prefetch)
    x_ref : VMEM (rt, C)       current layer's row tile
    o_ref : VMEM (rt, C) f32   output tile, resident across the layer axis
    """
    l = pl.program_id(1)

    @pl.when(l == 0)
    def _():
        o_ref[...] = jnp.zeros_like(o_ref)

    o_ref[...] += w_ref[l] * x_ref[...]


def _wlp_kernel_acc(w_ref, x_ref, o_ref, acc_ref):
    """Non-f32 output: tile-sized f32 accumulator, cast-only epilogue."""
    l = pl.program_id(1)

    @pl.when(l == 0)
    def _():
        acc_ref[...] = jnp.zeros_like(acc_ref)

    acc_ref[...] += w_ref[l] * x_ref[...].astype(jnp.float32)

    @pl.when(l == pl.num_programs(1) - 1)
    def _():
        o_ref[...] = acc_ref[...].astype(o_ref.dtype)


def _lane_layout(B, S, H):
    """Return (rows, lanes, H_eff).  lanes is always a multiple of 128.

    If H_eff != H, the caller must zero-pad the last dim to H_eff (and slice
    the output back) so that every store is a full-width, unmasked vst.
    """
    n = B * S * H
    if H % 128 == 0:
        return B * S, H, H
    if n % 128 == 0:
        for lanes in (4096, 2048, 1024, 512, 256, 128):
            if n % lanes == 0:
                return n // lanes, lanes, H
    h_pad = ((H + 127) // 128) * 128
    return B * S, h_pad, h_pad


def _choose_row_tile(R, C, itemsize, needs_acc):
    """Dtype-aware row tile: ~6 MiB of input per DMA, ~30 MiB total VMEM.

    VMEM footprint per row = 3x input (Buffered(3)) + 2x output (+ f32 acc).
    Prefers a divisor of R (multiple of 8 sublanes) to avoid a ragged edge tile.
    """
    dma_target_bytes = 6 << 20
    vmem_budget_bytes = 30 << 20
    per_row_bytes = C * (3 * itemsize + 2 * itemsize + (4 if needs_acc else 0))
    rows_dma = max(1, dma_target_bytes // (C * itemsize))
    rows_vmem = max(1, vmem_budget_bytes // per_row_bytes)
    target = min(rows_dma, rows_vmem)
    if target >= R:
        return R
    target = max(8, (target // 8) * 8)
    # Largest multiple-of-8 divisor of R within [target/2, target].
    d = target
    while d >= max(8, target // 2):
        if R % d == 0:
            return d
        d -= 8
    return target  # ragged last tile: Pallas pads/clips, correct but slightly slower


def weighted_layer_pooling(all_hidden_states, layer_weights, layer_start):
    """all_hidden_states: (num_layers+1, B, S, H); layer_weights: (num_layers+1-layer_start,)."""
    n_layers_total, B, S, H = all_hidden_states.shape
    L_used = n_layers_total - layer_start
    assert layer_weights.shape == (L_used,)

    # Pre-normalize weights host-side: kills the per-element divide in the kernel.
    # (Slightly different rounding vs divide-after-accumulate; within fp32 tolerance.)
    w = layer_weights.astype(jnp.float32)
    w_norm = w / jnp.sum(w)

    # Lane-dense slab: (layers, rows, lanes) with lanes a multiple of 128.
    R, C, H_eff = _lane_layout(B, S, H)
    x = all_hidden_states
    if H_eff != H:
        x = jnp.pad(x, ((0, 0), (0, 0), (0, 0), (0, H_eff - H)))
    x2d = x.reshape(n_layers_total, R, C)  # contiguous reshape (free)

    out_dtype = all_hidden_states.dtype
    direct = jnp.dtype(out_dtype) == jnp.dtype(jnp.float32)
    itemsize = jnp.dtype(out_dtype).itemsize

    rt = _choose_row_tile(R, C, itemsize, needs_acc=not direct)
    n_row_tiles = pl.cdiv(R, rt)

    def in_index_map(r, l, w_ref):      # scalar-prefetch ref is positional & unused
        return (l + layer_start, r, 0)

    def out_index_map(r, l, w_ref):
        return (r, 0)

    out_spec = pl.BlockSpec((rt, C), out_index_map)

    if direct:
        kernel = _wlp_kernel_direct
        scratch_shapes = ()
    else:
        kernel = _wlp_kernel_acc
        scratch_shapes = (pltpu.VMEM((rt, C), jnp.float32),)

    # Raise the scoped VMEM limit only when the footprint actually needs it
    # (safe on all generations: <= 38 MiB, under v7x's 64 MiB physical VMEM).
    footprint = rt * C * (3 * itemsize + 2 * itemsize + (0 if direct else 4))
    cp_kwargs = dict(dimension_semantics=("parallel", "arbitrary"))
    if footprint > (10 << 20):
        cp_kwargs["vmem_limit_bytes"] = int(min(48 << 20, footprint + (8 << 20)))
    compiler_params = pltpu.CompilerParams(**cp_kwargs)

    cost = pl.CostEstimate(
        flops=2 * L_used * R * C,
        transcendentals=0,
        bytes_accessed=(L_used + 1) * R * C * itemsize,
    )

    def build(use_buffered):
        spec_kwargs = {"pipeline_mode": pl.Buffered(3)} if use_buffered else {}
        in_specs = [pl.BlockSpec((pl.Squeezed(), rt, C), in_index_map, **spec_kwargs)]
        grid_spec = pltpu.PrefetchScalarGridSpec(
            num_scalar_prefetch=1,
            grid=(n_row_tiles, L_used),
            in_specs=in_specs,
            out_specs=out_spec,
            scratch_shapes=scratch_shapes,
        )
        return pl.pallas_call(
            kernel,
            out_shape=jax.ShapeDtypeStruct((R, C), out_dtype),
            grid_spec=grid_spec,
            compiler_params=compiler_params,
            cost_estimate=cost,
        )

    try:
        out2d = build(True)(w_norm, x2d)
    except Exception:
        # Fallback if this Pallas build does not accept BlockSpec(pipeline_mode=...).
        out2d = build(False)(w_norm, x2d)

    out = out2d.reshape(B, S, H_eff)
    if H_eff != H:
        out = out[..., :H]
    return out


def weighted_layer_pooling_ref(all_hidden_states, layer_weights, layer_start):
    x = all_hidden_states[layer_start:]
    w = layer_weights.reshape(-1, 1, 1, 1)
    return (w * x).sum(axis=0) / layer_weights.sum()


if __name__ == "__main__":
    # Small, forward-consistent shapes: 6 hidden layers (+embedding) -> 7 layers,
    # layer_start=4 -> 3 weighted layers; batch=2, seq=8, hidden=32.
    num_hidden_layers = 6
    layer_start = 4
    n_layers_total = num_hidden_layers + 1
    key = jax.random.PRNGKey(0)
    # Deterministic param init, matching nn.Parameter(torch.tensor([1]*L, dtype=float))
    layer_weights = jnp.ones((n_layers_total - layer_start,), dtype=jnp.float32)

    # Case 1: lane-dense factorization path (H*S*B divisible by 128).
    B, S, H = 2, 8, 32
    k1, k2 = jax.random.split(key)
    ahs = jax.random.normal(k1, (n_layers_total, B, S, H), dtype=jnp.float32)
    out = jax.block_until_ready(weighted_layer_pooling(ahs, layer_weights, layer_start))
    ref = weighted_layer_pooling_ref(ahs, layer_weights, layer_start)
    assert out.shape == (B, S, H)
    assert jnp.allclose(out, ref, atol=1e-5, rtol=1e-5), "mismatch vs reference (case 1)"

    # Case 2: padding path (trailing size not a multiple of 128).
    B2, S2, H2 = 2, 8, 20
    ahs2 = jax.random.normal(k2, (n_layers_total, B2, S2, H2), dtype=jnp.float32)
    out2 = jax.block_until_ready(weighted_layer_pooling(ahs2, layer_weights, layer_start))
    ref2 = weighted_layer_pooling_ref(ahs2, layer_weights, layer_start)
    assert out2.shape == (B2, S2, H2)
    assert jnp.allclose(out2, ref2, atol=1e-5, rtol=1e-5), "mismatch vs reference (case 2)"

    print("KERNEL_OK")
</pallas_src>

<mosaic_0001>
module attributes {stable_mosaic.version = 11 : i64} {
  func.func @_wlp_kernel_direct(%arg0: i32, %arg1: i32, %arg2: memref<3xf32, #tpu.memory_space<smem>>, %arg3: memref<1x1x512xf32, #tpu.memory_space<vmem>>, %arg4: memref<1x512xf32, #tpu.memory_space<vmem>>) attributes {dimension_semantics = [#tpu.dimension_semantics<parallel>, #tpu.dimension_semantics<arbitrary>], iteration_bounds = array<i64: 1, 3>, scalar_prefetch = 1 : i64, scratch_operands = 0 : i64, tpu.core_type = #tpu.core_type<tc>, window_params = [{transform_indices = @transform_0, window_bounds = array<i64: 1, 1, 512>}, {transform_indices = @transform_1, window_bounds = array<i64: 1, 512>}]} {
    %c0_i32 = arith.constant 0 : i32
    %0 = arith.cmpi eq, %arg1, %c0_i32 : i32
    %1 = arith.extui %0 : i1 to i32
    %c0_i32_0 = arith.constant 0 : i32
    %2 = arith.cmpi ne, %1, %c0_i32_0 : i32
    scf.if %2 {
      %cst = arith.constant 0.000000e+00 : f32
      %12 = vector.broadcast %cst : f32 to vector<1x512xf32>
      %c0_7 = arith.constant 0 : index
      %c0_8 = arith.constant 0 : index
      %13 = vector.load %arg4[%c0_7, %c0_8] : memref<1x512xf32, #tpu.memory_space<vmem>>, vector<1x512xf32>
      tpu.vector_store %arg4[%c0_7, %c0_8], %12 {strides = array<i32>} : memref<1x512xf32, #tpu.memory_space<vmem>>, vector<1x512xf32>,
    } else {
    }
    %c0 = arith.constant 0 : index
    %c0_1 = arith.constant 0 : index
    %3 = vector.load %arg4[%c0, %c0_1] : memref<1x512xf32, #tpu.memory_space<vmem>>, vector<1x512xf32>
    %4 = arith.index_cast %arg1 : i32 to index
    %5 = memref.load %arg2[%4] : memref<3xf32, #tpu.memory_space<smem>>
    %c0_2 = arith.constant 0 : index
    %c0_3 = arith.constant 0 : index
    %c0_4 = arith.constant 0 : index
    %6 = vector.load %arg3[%c0_2, %c0_3, %c0_4] : memref<1x1x512xf32, #tpu.memory_space<vmem>>, vector<1x1x512xf32>
    %7 = vector.shape_cast %6 : vector<1x1x512xf32> to vector<1x512xf32>
    %8 = vector.broadcast %5 : f32 to vector<1x512xf32>
    %9 = arith.mulf %8, %7 : vector<1x512xf32>
    %10 = arith.addf %3, %9 : vector<1x512xf32>
    %c0_5 = arith.constant 0 : index
    %c0_6 = arith.constant 0 : index
    %11 = vector.load %arg4[%c0_5, %c0_6] : memref<1x512xf32, #tpu.memory_space<vmem>>, vector<1x512xf32>
    tpu.vector_store %arg4[%c0_5, %c0_6], %10 {strides = array<i32>} : memref<1x512xf32, #tpu.memory_space<vmem>>, vector<1x512xf32>,
    return
  }
  func.func @transform_0(%arg0: i32, %arg1: i32, %arg2: memref<3xf32, #tpu.memory_space<smem>>) -> (i32, i32, i32) {
    %c4_i32 = arith.constant 4 : i32
    %0 = arith.addi %arg1, %c4_i32 : i32
    %c0_i32 = arith.constant 0 : i32
    %c0_i32_0 = arith.constant 0 : i32
    return %0, %arg0, %c0_i32 : i32, i32, i32
  }
  func.func @transform_1(%arg0: i32, %arg1: i32, %arg2: memref<3xf32, #tpu.memory_space<smem>>) -> (i32, i32) {
    %c0_i32 = arith.constant 0 : i32
    %c0_i32_0 = arith.constant 0 : i32
    return %arg0, %c0_i32 : i32, i32
  }
}

</mosaic_0001>

<bundles_post_ra>
// kernel: tpu_custom_call.1
= control target key start
LH: loop header
LB: loop body
LE: loop exit
PB: predicated region body
PF: predicated region fallthrough
CT: control target
= control target key end

     0   :  { %s631_s0 = inlined_call_operand.hbm [shape: f32[3], index: 0, kind: input, shape index: {}]   ;;  %s632_s1 = inlined_call_operand.hbm [shape: f32[7,1,512], index: 1, kind: input, shape index: {}]   ;;  %s633_s2 = inlined_call_operand.hbm [shape: f32[1,512], index: 2, kind: output, shape index: {}]  }
   0x1   :  { %s324_s11 = scalar_lea.hbm %s631_s0, 16 }
   0x2   :  { %p325_p0 = scmp.ne.s32.totalorder %s631_s0, %s324_s11  ;;  %p328_p1 = scmp.lt.u32.totalorder %s324_s11, %s631_s0 }
   0x4   :  { %p330_p2 = pnand %p328_p1, %p325_p0 }
   0x6   :  { %333 = shalt.err (!%p330_p2)  }
   0x7   :  { %s449_s16 = smov [#allocation3]  }
   0x8   :  { %8 = dma.hbm_to_smem %s631_s0, 16, %s449_s16, [#allocation2] }
   0x9   :  { %415 = dma.done.wait [#allocation2], 16 }
   0xa   :  { %416 = vsyncadd [#allocation2], 4294967280 }
   0xb   :  { %10 = sfence }
   0xc   :  { %11 = vsyncpa [#allocation5], 0 }
   0xd   :  { %13 = vsyncpa [#allocation5 + $0x1], 0 }
   0xe   :  { %14 = vsyncpa [#allocation6], 0  ;;  %s480_s19 = smov 0   ;;  %s482_s20 = smov 0  }
   0xf   :  { %s484_s21 = smov 0   ;;  %s486_s22 = smov 0  }
  0x10   :  { %s488_s23 = smov 0   ;;  %s490_s24 = smov 0  }
  0x11 LB: > { %s246_s0 = sadd.s32 4294967295, %s447_s24   ;;  %s29_s25 = sadd.s32 1, %s443_s23  ;;  %s447_s24 = sphi %s490_s24, %s20_s24   ;;  %s443_s23 = sphi %s488_s23, %s644_s23   ;;  %s439_s22 = sphi %s486_s22, %s643_s22   ;;  %s435_s21 = sphi %s484_s21, %s642_s21   ;;  %s431_s20 = sphi %s482_s20, %s641_s20   ;;  %s427_s19 = sphi %s480_s19, %s640_s19  }
  0x12   : > { %p30_p3 = scmp.ge.s32.totalorder %s29_s25, 3  ;;  %s36_s26 = sadd.s32 4, %s443_s23 }
  0x13   : > { %s43_s27 = sadd.s32 1, %s435_s21  ;;  %p50_p4 = scmp.ne.s32.totalorder %s435_s21, %s431_s20 }
  0x14   : > { %s646_s25 = smov (%p30_p3, %s29_s25), 0  ;;  %p51_p5 = scmp.eq.s32.totalorder %s447_s24, 0 }
  0x15   : > { %p56_p6 = scmp.ne.s32.totalorder %s431_s20, %s427_s19  ;;  %s37_s28 = sadd.s32 4, %s646_s25 }
  0x16   : > { %p57_p7 = scmp.eq.s32.totalorder %s246_s0, 0  ;;  %s38_s29 = ssub.s32 %s36_s26, %s37_s28 }
  0x17   : > { %p521_p8 = por %p51_p5, %p50_p4  ;;  %p41_p9 = scmp.eq.s32.totalorder %s38_s29, 0 }
  0x18   : > { %p525_p10 = por %p57_p7, %p56_p6  ;;  %p270_p11 = scmp.lt.s32.totalorder %s447_s24, 3 }
  0x19   : > { %s531_s4 = scalar_select %p41_p9, %s435_s21, %s43_s27  }
  0x1a   : > { %s106_s5 = sand.u32 1, %s435_s21   ;;  %s259_s6 = sshll.u32 %s443_s23, 6 }
  0x1b   : > { %s249_s7 = sshll.u32 %s106_s5, 2  ;;  %s207_s10 = scalar_lea.hbm %s632_s1, %s259_s6 }
  0x1c   : > { %s538_s11 = scalar_lea.hbm %s207_s10, 256  ;;  %s110_s12 = scalar_lea.vmem [#allocation4], %s249_s7 }
  0x1d   : > { %s121_s13 = sshll.u32 %s110_s12, 4  ;;  %p544_p12 = pnand %p270_p11, %p521_p8  ;;  %s540_s13 = int_to_ptr.vmem [resolvable:$true] %s121_s13 }
  0x1e   : > { %s107_s15 = scalar_lea.sflag [#allocation5], %s106_s5  ;;  %s364_s16 = scalar_lea.hbm %s207_s10, 320 }
  0x1f   : > { %p335_p1 = scmp.ne.s32.totalorder %s538_s11, %s364_s16  ;;  %p336_p2 = pneg %p544_p12 }
  0x20   : > { %s339_s19 = scalar_lea.hbm %s632_s1, 448  ;;  %p340_p5 = scmp.lt.u32.totalorder %s538_s11, %s632_s1 }
  0x21   : > { %p337_p3 = pnand %p336_p2, %p335_p1  ;;  %p341_p6 = scmp.lt.u32.totalorder %s339_s19, %s364_s16 }
  0x22   : > { %p343_p8 = scmp.lt.u32.totalorder %s364_s16, %s538_s11 }
  0x23   : > { %p338_p4 = pneg %p337_p3  ;;  %p342_p7 = por %p341_p6, %p340_p5 }
  0x25   : > { %p344_p9 = por %p343_p8, %p342_p7 }
  0x27   : > { %p345_p11 = pnand %p344_p9, %p338_p4 }
  0x29   : > { %348 = shalt.err (!%p345_p11)
}
  0x2a   : > { %s349_s28 = scalar_lea.vmem %s540_s13, 64  ;;  %s450_s29 = smov [#allocation4]  }
  0x2b   : > { %p350_p1 = scmp.ne.s32.totalorder %s540_s13, %s349_s28  ;;  %s354_s30 = sshll.u32 %s450_s29, 4  ;;  %s355_s30 = int_to_ptr.vmem [resolvable:$false] %s354_s30 }
  0x2c   : > { %s356_s5 = scalar_lea.vmem %s355_s30, 128  ;;  %p357_p0 = scmp.lt.s32.totalorder %s540_s13, %s355_s30 }
  0x2d   : > { %p352_p3 = pnand %p350_p1, %p336_p2  ;;  %p358_p5 = scmp.lt.s32.totalorder %s356_s5, %s349_s28 }
  0x2f   : > { %p353_p13 = pneg %p352_p3  ;;  %p359_p6 = por %p358_p5, %p357_p0 }
  0x31   : > { %p360_p7 = pnand %p359_p6, %p353_p13 }
  0x33   : > { %363 = shalt.err (!%p360_p7)
}
  0x34   : > { %269 = dma.hbm_to_vmem [thread:$0]  (!%p544_p12), %s538_s11, 64, %s540_s13, %s107_s15  }
  0x35   : > { %p637_p4 = scmp.lt.s32.totalorder %s447_s24, 4  ;;  %p638_p8 = scmp.ge.s32.totalorder %s447_s24, 1 }
  0x37   : > { %p127_p2 = pnand %p638_p8, %p637_p4 }
  0x38   : > { %s132_s6 = sand.u32 (!%p127_p2), 1, %s431_s20  }
  0x39   : > { %130 = sbr.rel (%p127_p2) target bundleno = 100 (0x64), region = 24  ;;  %s253_s7 = sshll.u32 (!%p127_p2), %s132_s6, 2 }
  0x3a   : > { %s133_s8 = scalar_lea.sflag (!%p127_p2), [#allocation5], %s132_s6  ;;  %s136_s9 = scalar_lea.vmem (!%p127_p2), [#allocation4], %s253_s7 }
  0x40   : > { %418 = dma.done.wait (%p525_p10), %s133_s8, 64  }
  0x41   : > { %420 = vsyncadd (%p525_p10), %s133_s8, 4294967232  ;;  %p254_p13 = scmp.ne.s32.totalorder %s439_s22, 0 }
  0x42   : > { %v155_v0 = vlaneseq (!%p254_p13)  ;;  %v451_v1 = vmov (!%p254_p13), 0.0  }
  0x43   : > { %154 = sbr.rel (%p254_p13) target bundleno = 74 (0x4a), region = 32 }
  0x44   : > { %vm157_vm0 = vcmp.lt.s32.totalorder (!%p254_p13), %v155_v0, 512 }
  0x45   : > { %159 = vst.msk [vmem:[#allocation7] sm:$0xf] (!%p254_p13), %vm157_vm0, %v451_v1 }
  0x4a PF: > { %s161_s10 = sld [smem:[#allocation3 + %s439_s22]]  ;;  %v162_v2 = vld [vmem:[%s136_s9] sm:$0xf]  ;;  %v166_v3 = vlaneseq  ;;  %s452_s11 = smov [#allocation7]  }
  0x4b   : > { %s181_s12 = sshll.u32 %s452_s11, 4  ;;  %p587_p10 = scmp.eq.s32.totalorder %s246_s0, 2  ;;  %s182_s12 = int_to_ptr.vmem [resolvable:$true] %s181_s12 }
  0x4c   : > { %v160_v4 = vld [vmem:[#allocation7] sm:$0xf]  ;;  %vm168_vm1 = vcmp.lt.s32.totalorder %v166_v3, 512  ;;  %s365_s13 = scalar_lea.vmem %s182_s12, 64  ;;  %p372_p11 = scmp.lt.s32.totalorder %s182_s12, %s182_s12 }
  0x4d   : > { %p366_p12 = scmp.ne.s32.totalorder %s182_s12, %s365_s13  ;;  %p373_p1 = scmp.lt.s32.totalorder %s365_s13, %s365_s13 }
  0x4f   : > { %p367_p0 = pnand %p366_p12, %p587_p10  ;;  %p374_p3 = por %p373_p1, %p372_p11 }
  0x50   : > { %v163_v5 = vstv %s161_s10 }
  0x51   : > { %v164_v6 = vmul.f32 %v163_v5, %v162_v2  ;;  %p368_p9 = pneg %p367_p0 }
  0x53   : > { %v165_v7 = vadd.f32 %v164_v6, %v160_v4  ;;  %p375_p5 = pnand %p374_p3, %p368_p9 }
  0x55   : > { %170 = vst.msk [vmem:[#allocation7] sm:$0xf] %vm168_vm1, %v165_v7 }
  0x56   : > { %378 = shalt.err (!%p375_p5)
}
  0x57   : > { %s379_s0 = scalar_lea.hbm %s633_s2, 64 }
  0x58   : > { %p380_p6 = scmp.ne.s32.totalorder %s633_s2, %s379_s0  ;;  %p385_p8 = scmp.lt.u32.totalorder %s379_s0, %s633_s2 }
  0x5a   : > { %p381_p7 = pnand %p380_p6, %p587_p10 }
  0x5c   : > { %p382_p4 = pneg %p381_p7 }
  0x5e   : > { %p387_p2 = pnand %p385_p8, %p382_p4 }
  0x60   : > { %390 = shalt.err (!%p387_p2)
}
  0x61   : > { %263 = dma.vmem_to_hbm [thread:$0]  (%p587_p10), %s182_s12, 64, %s633_s2, [#allocation6]  }
  0x62   : > { %422 = dma.done.wait (%p587_p10), [#allocation6], 64  }
  0x63   : > { %424 = vsyncadd (%p587_p10), [#allocation6], 4294967232 }
  0x64 PF: > { %s20_s24 = sadd.s32 1, %s447_s24   ;;  %s640_s19 = smov %s431_s20 }
  0x65   : > { %p17_p13 = scmp.ge.s32.totalorder %s20_s24, 5   ;;  %s641_s20 = smov %s435_s21 }
  0x66   : > { %s642_s21 = smov %s531_s4  ;;  %s643_s22 = smov %s443_s23 }
  0x67   : > { %s644_s23 = smov %s646_s25  ;;  %19 = sbr.rel (!%p17_p13) target bundleno = 17 (0x11), region = 66 }
  0x6e   :  { %194 = vsyncpa [#allocation5], 1 }
  0x6f   :  { %196 = vsyncpa [#allocation5 + $0x1], 1 }
  0x70   :  { %197 = vsyncpa [#allocation6], 1 }
  0x71   :  { %199 = vsyncpa [#allocation6 + $0x1], 1 }

</bundles_post_ra>
